<compile_context>
chip_gen: v7x
topology: tpu7x:2x2x1
jax: 0.10.0
libtpu: 0.0.40
codegen_flags: <defaults>
</compile_context>

<pallas_src>
import jax
import jax.numpy as jnp
from jax import lax
from jax.experimental import pallas as pl
from jax.experimental.pallas import tpu as pltpu

LANES = 128
NEG_INF = -1e30  # f32 additive mask value. NOTE: switch to dtype-min if the
                 # softmax math is ever moved to bf16.


def _gat_layer(x, w, a_src, a_dst, bias, mask_add, *, apply_relu):
    """One GATConv layer on in-VMEM arrays. All shapes lane-padded to 128."""
    # h = x @ W : bf16 operands, f32 accumulation on the MXU.
    h = jnp.dot(x.astype(jnp.bfloat16), w.astype(jnp.bfloat16),
                preferred_element_type=jnp.float32)                    # [N, F]

    # Per-node attention logits as feature-axis contractions (MXU, no XLU
    # transpose): column of dst logits and row of src logits.
    dst_col = lax.dot_general(h, a_dst,
                              dimension_numbers=(((1,), (1,)), ((), ())),
                              preferred_element_type=jnp.float32)      # [N, 1]
    src_row = lax.dot_general(a_src, h,
                              dimension_numbers=(((1,), (1,)), ((), ())),
                              preferred_element_type=jnp.float32)      # [1, N]

    # e[i, j] = LeakyReLU(dst[i] + src[j], 0.2) + additive mask.
    e = dst_col + src_row                                              # [N, N]
    e = jnp.where(e > 0.0, e, 0.2 * e)
    e = e + mask_add

    # Row softmax; masked entries underflow to exactly 0 after exp.
    m = jnp.max(e, axis=-1, keepdims=True)
    p = jnp.exp(e - m)
    denom = jnp.sum(p, axis=-1, keepdims=True)
    alpha = p * pl.reciprocal(denom, approx=True)                      # [N, N]

    # Aggregate neighbor features (MXU, bf16 operands) + bias.
    out = jnp.dot(alpha.astype(jnp.bfloat16), h.astype(jnp.bfloat16),
                  preferred_element_type=jnp.float32) + bias
    if apply_relu:
        out = jnp.maximum(out, 0.0)
    return out


def gcn_fused_kernel(x_ref, w1_ref, asrc1_ref, adst1_ref, b1_ref,
                     w2_ref, asrc2_ref, adst2_ref, b2_ref,
                     mask_ref, o_ref):
    mask_add = mask_ref[...]
    # conv1 -> ReLU (fused) -> dropout (eval: identity) -> conv2
    h1 = _gat_layer(x_ref[...], w1_ref[...], asrc1_ref[...], adst1_ref[...],
                    b1_ref[...], mask_add, apply_relu=True)
    logits = _gat_layer(h1, w2_ref[...], asrc2_ref[...], adst2_ref[...],
                        b2_ref[...], mask_add, apply_relu=False)
    o_ref[...] = logits.astype(o_ref.dtype)


def _pad_lanes(a, axis, target=LANES):
    pad = target - a.shape[axis]
    if pad <= 0:
        return a
    widths = [(0, 0)] * a.ndim
    widths[axis] = (0, pad)
    return jnp.pad(a, widths)


def gcn_forward(x, adj, params1, params2):
    """Fused two-layer GAT forward. Returns [N, out_channels] logits."""
    n, _ = x.shape
    out_c = params2[0].shape[1]

    # Lane-dense zero padding of every feature dim to 128 (exact: padded
    # columns carry zeros through both layers); sliced back after the call.
    xp = _pad_lanes(x, 1)
    w1, as1, ad1, b1 = params1
    w2, as2, ad2, b2 = params2
    w1p = _pad_lanes(_pad_lanes(w1, 0), 1)
    w2p = _pad_lanes(_pad_lanes(w2, 0), 1)
    as1p, ad1p, b1p = (_pad_lanes(a, 1) for a in (as1, ad1, b1))
    as2p, ad2p, b2p = (_pad_lanes(a, 1) for a in (as2, ad2, b2))

    # Additive adjacency mask precomputed on host: 0 where edge, -1e30 else.
    mask_add = jnp.where(adj > 0.0, 0.0, NEG_INF).astype(jnp.float32)

    vmem = pl.BlockSpec(memory_space=pltpu.MemorySpace.VMEM)
    out_padded = pl.pallas_call(
        gcn_fused_kernel,
        out_shape=jax.ShapeDtypeStruct((n, LANES), jnp.float32),
        in_specs=[vmem] * 10,
        out_specs=vmem,
    )(xp, w1p, as1p, ad1p, b1p, w2p, as2p, ad2p, b2p, mask_add)
    return out_padded[:, :out_c]


def init_gat_params(key, f_in, f_out):
    """Deterministic glorot-ish init matching GATConv parameter shapes."""
    k1, k2, k3 = jax.random.split(key, 3)
    scale_w = (2.0 / (f_in + f_out)) ** 0.5
    scale_a = (2.0 / (1 + f_out)) ** 0.5
    w = scale_w * jax.random.normal(k1, (f_in, f_out), jnp.float32)
    att_src = scale_a * jax.random.normal(k2, (1, f_out), jnp.float32)
    att_dst = scale_a * jax.random.normal(k3, (1, f_out), jnp.float32)
    bias = jnp.zeros((1, f_out), jnp.float32)
    return w, att_src, att_dst, bias


def build_dense_adj(edge_index, num_nodes):
    """adj[dst, src] = 1.0 for every edge src->dst, plus self loops."""
    src, dst = edge_index[0], edge_index[1]
    adj = jnp.zeros((num_nodes, num_nodes), jnp.float32)
    adj = adj.at[dst, src].set(1.0)
    adj = adj + jnp.eye(num_nodes, dtype=jnp.float32)  # add_self_loops=True
    return jnp.minimum(adj, 1.0)


if __name__ == "__main__":
    key = jax.random.PRNGKey(0)
    k_x, k_e, k_p1, k_p2 = jax.random.split(key, 4)

    num_nodes = 64
    in_channels = 16
    hidden_channels = 32
    out_channels = 8
    num_edges = 256

    # Node features and a deterministic random edge_index [2, E].
    x = jax.random.normal(k_x, (num_nodes, in_channels), jnp.float32)
    edge_index = jax.random.randint(k_e, (2, num_edges), 0, num_nodes,
                                    dtype=jnp.int32)
    adj = build_dense_adj(edge_index, num_nodes)

    params1 = init_gat_params(k_p1, in_channels, hidden_channels)
    params2 = init_gat_params(k_p2, hidden_channels, out_channels)

    logits = gcn_forward(x, adj, params1, params2)
    jax.block_until_ready(logits)
    assert logits.shape == (num_nodes, out_channels)
    assert bool(jnp.all(jnp.isfinite(logits)))
    print("KERNEL_OK")
</pallas_src>

<mosaic_0001>
module attributes {stable_mosaic.version = 11 : i64} {
  func.func @gcn_fused_kernel(%arg0: memref<64x128xf32, #tpu.memory_space<vmem>>, %arg1: memref<128x128xf32, #tpu.memory_space<vmem>>, %arg2: memref<1x128xf32, #tpu.memory_space<vmem>>, %arg3: memref<1x128xf32, #tpu.memory_space<vmem>>, %arg4: memref<1x128xf32, #tpu.memory_space<vmem>>, %arg5: memref<128x128xf32, #tpu.memory_space<vmem>>, %arg6: memref<1x128xf32, #tpu.memory_space<vmem>>, %arg7: memref<1x128xf32, #tpu.memory_space<vmem>>, %arg8: memref<1x128xf32, #tpu.memory_space<vmem>>, %arg9: memref<64x64xf32, #tpu.memory_space<vmem>>, %arg10: memref<64x128xf32, #tpu.memory_space<vmem>>) attributes {dimension_semantics = [], scalar_prefetch = 0 : i64, scratch_operands = 0 : i64, tpu.core_type = #tpu.core_type<tc>} {
    %c0 = arith.constant 0 : index
    %c0_0 = arith.constant 0 : index
    %0 = vector.load %arg9[%c0, %c0_0] : memref<64x64xf32, #tpu.memory_space<vmem>>, vector<64x64xf32>
    %c0_1 = arith.constant 0 : index
    %c0_2 = arith.constant 0 : index
    %1 = vector.load %arg0[%c0_1, %c0_2] : memref<64x128xf32, #tpu.memory_space<vmem>>, vector<64x128xf32>
    %c0_3 = arith.constant 0 : index
    %c0_4 = arith.constant 0 : index
    %2 = vector.load %arg1[%c0_3, %c0_4] : memref<128x128xf32, #tpu.memory_space<vmem>>, vector<128x128xf32>
    %c0_5 = arith.constant 0 : index
    %c0_6 = arith.constant 0 : index
    %3 = vector.load %arg2[%c0_5, %c0_6] : memref<1x128xf32, #tpu.memory_space<vmem>>, vector<1x128xf32>
    %c0_7 = arith.constant 0 : index
    %c0_8 = arith.constant 0 : index
    %4 = vector.load %arg3[%c0_7, %c0_8] : memref<1x128xf32, #tpu.memory_space<vmem>>, vector<1x128xf32>
    %c0_9 = arith.constant 0 : index
    %c0_10 = arith.constant 0 : index
    %5 = vector.load %arg4[%c0_9, %c0_10] : memref<1x128xf32, #tpu.memory_space<vmem>>, vector<1x128xf32>
    %6 = arith.truncf %1 : vector<64x128xf32> to vector<64x128xbf16>
    %7 = arith.truncf %2 : vector<128x128xf32> to vector<128x128xbf16>
    %cst = arith.constant dense<0.000000e+00> : vector<64x128xf32>
    %8 = tpu.matmul %6, %7, %cst {dimension_numbers = #tpu.dot_dimension_numbers<[1], [0], [0], [1], [0, 0, 1, 1], [], []>} : vector<64x128xbf16>, vector<128x128xbf16>, vector<64x128xf32> -> vector<64x128xf32>
    %cst_11 = arith.constant dense<0.000000e+00> : vector<64x1xf32>
    %9 = tpu.matmul %8, %4, %cst_11 {dimension_numbers = #tpu.dot_dimension_numbers<[1], [1], [0], [0], [0, 0, 1, 0], [], []>} : vector<64x128xf32>, vector<1x128xf32>, vector<64x1xf32> -> vector<64x1xf32>
    %cst_12 = arith.constant dense<0.000000e+00> : vector<1x64xf32>
    %10 = tpu.matmul %3, %8, %cst_12 {dimension_numbers = #tpu.dot_dimension_numbers<[1], [1], [0], [0], [0, 0, 1, 0], [], []>} : vector<1x128xf32>, vector<64x128xf32>, vector<1x64xf32> -> vector<1x64xf32>
    %11 = vector.broadcast %9 : vector<64x1xf32> to vector<64x64xf32>
    %12 = vector.broadcast %10 : vector<1x64xf32> to vector<64x64xf32>
    %13 = arith.addf %11, %12 : vector<64x64xf32>
    %cst_13 = arith.constant 0.000000e+00 : f32
    %14 = vector.broadcast %cst_13 : f32 to vector<64x64xf32>
    %15 = arith.cmpf ogt, %13, %14 : vector<64x64xf32>
    %cst_14 = arith.constant 2.000000e-01 : f32
    %16 = vector.broadcast %cst_14 : f32 to vector<64x64xf32>
    %17 = arith.mulf %16, %13 : vector<64x64xf32>
    %18 = arith.select %15, %13, %17 : vector<64x64xi1>, vector<64x64xf32>
    %19 = arith.addf %18, %0 : vector<64x64xf32>
    %cst_15 = arith.constant dense<0xFF800000> : vector<64xf32>
    %20 = vector.multi_reduction <maximumf>, %19, %cst_15 [1] : vector<64x64xf32> to vector<64xf32>
    %21 = vector.shape_cast %20 : vector<64xf32> to vector<64x1xf32>
    %22 = vector.broadcast %21 : vector<64x1xf32> to vector<64x64xf32>
    %23 = arith.subf %19, %22 : vector<64x64xf32>
    %24 = math.exp %23 : vector<64x64xf32>
    %cst_16 = arith.constant dense<0.000000e+00> : vector<64xf32>
    %25 = vector.multi_reduction <add>, %24, %cst_16 [1] : vector<64x64xf32> to vector<64xf32>
    %26 = vector.shape_cast %25 : vector<64xf32> to vector<64x1xf32>
    %27 = tpu.reciprocal %26 {approx = true} : vector<64x1xf32> -> vector<64x1xf32>
    %28 = vector.broadcast %27 : vector<64x1xf32> to vector<64x64xf32>
    %29 = arith.mulf %24, %28 : vector<64x64xf32>
    %30 = arith.truncf %29 : vector<64x64xf32> to vector<64x64xbf16>
    %31 = arith.truncf %8 : vector<64x128xf32> to vector<64x128xbf16>
    %cst_17 = arith.constant dense<0.000000e+00> : vector<64x128xf32>
    %32 = tpu.matmul %30, %31, %cst_17 {dimension_numbers = #tpu.dot_dimension_numbers<[1], [0], [0], [1], [0, 0, 1, 1], [], []>} : vector<64x64xbf16>, vector<64x128xbf16>, vector<64x128xf32> -> vector<64x128xf32>
    %33 = vector.broadcast %5 : vector<1x128xf32> to vector<64x128xf32>
    %34 = arith.addf %32, %33 : vector<64x128xf32>
    %cst_18 = arith.constant 0.000000e+00 : f32
    %35 = vector.broadcast %cst_18 : f32 to vector<64x128xf32>
    %36 = arith.maximumf %34, %35 : vector<64x128xf32>
    %c0_19 = arith.constant 0 : index
    %c0_20 = arith.constant 0 : index
    %37 = vector.load %arg5[%c0_19, %c0_20] : memref<128x128xf32, #tpu.memory_space<vmem>>, vector<128x128xf32>
    %c0_21 = arith.constant 0 : index
    %c0_22 = arith.constant 0 : index
    %38 = vector.load %arg6[%c0_21, %c0_22] : memref<1x128xf32, #tpu.memory_space<vmem>>, vector<1x128xf32>
    %c0_23 = arith.constant 0 : index
    %c0_24 = arith.constant 0 : index
    %39 = vector.load %arg7[%c0_23, %c0_24] : memref<1x128xf32, #tpu.memory_space<vmem>>, vector<1x128xf32>
    %c0_25 = arith.constant 0 : index
    %c0_26 = arith.constant 0 : index
    %40 = vector.load %arg8[%c0_25, %c0_26] : memref<1x128xf32, #tpu.memory_space<vmem>>, vector<1x128xf32>
    %41 = arith.truncf %36 : vector<64x128xf32> to vector<64x128xbf16>
    %42 = arith.truncf %37 : vector<128x128xf32> to vector<128x128xbf16>
    %cst_27 = arith.constant dense<0.000000e+00> : vector<64x128xf32>
    %43 = tpu.matmul %41, %42, %cst_27 {dimension_numbers = #tpu.dot_dimension_numbers<[1], [0], [0], [1], [0, 0, 1, 1], [], []>} : vector<64x128xbf16>, vector<128x128xbf16>, vector<64x128xf32> -> vector<64x128xf32>
    %cst_28 = arith.constant dense<0.000000e+00> : vector<64x1xf32>
    %44 = tpu.matmul %43, %39, %cst_28 {dimension_numbers = #tpu.dot_dimension_numbers<[1], [1], [0], [0], [0, 0, 1, 0], [], []>} : vector<64x128xf32>, vector<1x128xf32>, vector<64x1xf32> -> vector<64x1xf32>
    %cst_29 = arith.constant dense<0.000000e+00> : vector<1x64xf32>
    %45 = tpu.matmul %38, %43, %cst_29 {dimension_numbers = #tpu.dot_dimension_numbers<[1], [1], [0], [0], [0, 0, 1, 0], [], []>} : vector<1x128xf32>, vector<64x128xf32>, vector<1x64xf32> -> vector<1x64xf32>
    %46 = vector.broadcast %44 : vector<64x1xf32> to vector<64x64xf32>
    %47 = vector.broadcast %45 : vector<1x64xf32> to vector<64x64xf32>
    %48 = arith.addf %46, %47 : vector<64x64xf32>
    %cst_30 = arith.constant 0.000000e+00 : f32
    %49 = vector.broadcast %cst_30 : f32 to vector<64x64xf32>
    %50 = arith.cmpf ogt, %48, %49 : vector<64x64xf32>
    %cst_31 = arith.constant 2.000000e-01 : f32
    %51 = vector.broadcast %cst_31 : f32 to vector<64x64xf32>
    %52 = arith.mulf %51, %48 : vector<64x64xf32>
    %53 = arith.select %50, %48, %52 : vector<64x64xi1>, vector<64x64xf32>
    %54 = arith.addf %53, %0 : vector<64x64xf32>
    %cst_32 = arith.constant dense<0xFF800000> : vector<64xf32>
    %55 = vector.multi_reduction <maximumf>, %54, %cst_32 [1] : vector<64x64xf32> to vector<64xf32>
    %56 = vector.shape_cast %55 : vector<64xf32> to vector<64x1xf32>
    %57 = vector.broadcast %56 : vector<64x1xf32> to vector<64x64xf32>
    %58 = arith.subf %54, %57 : vector<64x64xf32>
    %59 = math.exp %58 : vector<64x64xf32>
    %cst_33 = arith.constant dense<0.000000e+00> : vector<64xf32>
    %60 = vector.multi_reduction <add>, %59, %cst_33 [1] : vector<64x64xf32> to vector<64xf32>
    %61 = vector.shape_cast %60 : vector<64xf32> to vector<64x1xf32>
    %62 = tpu.reciprocal %61 {approx = true} : vector<64x1xf32> -> vector<64x1xf32>
    %63 = vector.broadcast %62 : vector<64x1xf32> to vector<64x64xf32>
    %64 = arith.mulf %59, %63 : vector<64x64xf32>
    %65 = arith.truncf %64 : vector<64x64xf32> to vector<64x64xbf16>
    %66 = arith.truncf %43 : vector<64x128xf32> to vector<64x128xbf16>
    %cst_34 = arith.constant dense<0.000000e+00> : vector<64x128xf32>
    %67 = tpu.matmul %65, %66, %cst_34 {dimension_numbers = #tpu.dot_dimension_numbers<[1], [0], [0], [1], [0, 0, 1, 1], [], []>} : vector<64x64xbf16>, vector<64x128xbf16>, vector<64x128xf32> -> vector<64x128xf32>
    %68 = vector.broadcast %40 : vector<1x128xf32> to vector<64x128xf32>
    %69 = arith.addf %67, %68 : vector<64x128xf32>
    %c0_35 = arith.constant 0 : index
    %c0_36 = arith.constant 0 : index
    %70 = vector.load %arg10[%c0_35, %c0_36] : memref<64x128xf32, #tpu.memory_space<vmem>>, vector<64x128xf32>
    tpu.vector_store %arg10[%c0_35, %c0_36], %69 {strides = array<i32>} : memref<64x128xf32, #tpu.memory_space<vmem>>, vector<64x128xf32>,
    return
  }
}

</mosaic_0001>

<bundles_post_ra>
// kernel: tpu_custom_call.1
= control target key start
LH: loop header
LB: loop body
LE: loop exit
PB: predicated region body
PF: predicated region fallthrough
CT: control target
= control target key end

     0   :  { %15 = vsyncpa [#allocation3], 0  ;;  %s1681_s0 = inlined_call_operand.hbm [shape: f32[64,128], index: 0, kind: input, shape index: {}]   ;;  %s1682_s1 = inlined_call_operand.hbm [shape: f32[128,128], index: 1, kind: input, shape index: {}]   ;;  %s1683_s2 = inlined_call_operand.vmem [shape: f32[1,128], index: 2, kind: input, shape index: {}]   ;;  %s1684_s3 = inlined_call_operand.vmem [shape: f32[1,128], index: 3, kind: input, shape index: {}]   ;;  %s1685_s4 = inlined_call_operand.vmem [shape: f32[1,128], index: 4, kind: input, shape index: {}]   ;;  %s1686_s5 = inlined_call_operand.hbm [shape: f32[128,128], index: 5, kind: input, shape index: {}]   ;;  %s1687_s6 = inlined_call_operand.vmem [shape: f32[1,128], index: 6, kind: input, shape index: {}]   ;;  %s1688_s7 = inlined_call_operand.vmem [shape: f32[1,128], index: 7, kind: input, shape index: {}]   ;;  %s1689_s8 = inlined_call_operand.vmem [shape: f32[1,128], index: 8, kind: input, shape index: {}]   ;;  %s1690_s9 = inlined_call_operand.hbm [shape: f32[64,64], index: 9, kind: input, shape index: {}]   ;;  %s1691_s10 = inlined_call_operand.hbm [shape: f32[64,128], index: 10, kind: output, shape index: {}]  }
   0x1   :  { %16 = vsyncpa [#allocation6], 0 }
   0x2   :  { %17 = vsyncpa [#allocation9], 0 }
   0x3   :  { %18 = vsyncpa [#allocation4], 0  ;;  %s1386_s13 = smov [#allocation5]   ;;  %s1387_s15 = smov [#allocation2]  }
   0x4   :  { %s36_s14 = sshll.u32 %s1386_s13, 4  ;;  %s24_s16 = sshll.u32 %s1387_s15, 4  ;;  %s37_s14 = int_to_ptr.vmem [resolvable:$true] %s36_s14  ;;  %s1451_s16 = int_to_ptr.vmem [resolvable:$true] %s24_s16 }
   0x5   :  { %s1268_s19 = scalar_lea.hbm %s1682_s1, 2048 }
   0x6   :  { %p1269_p0 = scmp.ne.s32.totalorder %s1682_s1, %s1268_s19  ;;  %p1272_p1 = scmp.lt.u32.totalorder %s1268_s19, %s1682_s1 }
   0x8   :  { %p1274_p2 = pnand %p1272_p1, %p1269_p0 }
   0xa   :  { %1277 = shalt.err (!%p1274_p2)
}
   0xb   :  { %s1278_s24 = scalar_lea.vmem %s37_s14, 2048  ;;  %p1283_p4 = scmp.lt.s32.totalorder %s37_s14, %s37_s14 }
   0xc   :  { %p1279_p3 = scmp.ne.s32.totalorder %s37_s14, %s1278_s24  ;;  %p1284_p5 = scmp.lt.s32.totalorder %s1278_s24, %s1278_s24 }
   0xe   :  { %p1285_p6 = por %p1284_p5, %p1283_p4 }
  0x10   :  { %p1286_p7 = pnand %p1285_p6, %p1279_p3 }
  0x12   :  { %1289 = shalt.err (!%p1286_p7)
}
  0x13   :  { %s1388_s25 = smov 128   ;;  %s1389_s26 = smov 8  }
  0x14   :  { %42 = dma.hbm_to_vmem [thread:$0]  %s1682_s1, 2048, %s37_s14, [#allocation6], %s1388_s25, %s1388_s25, %s1389_s26  }
  0x15   :  { %s1290_s11 = scalar_lea.hbm %s1681_s0, 1024 }
  0x16   :  { %p1291_p8 = scmp.ne.s32.totalorder %s1681_s0, %s1290_s11  ;;  %p1294_p9 = scmp.lt.u32.totalorder %s1290_s11, %s1681_s0 }
  0x18   :  { %p1296_p10 = pnand %p1294_p9, %p1291_p8 }
  0x1a   :  { %1299 = shalt.err (!%p1296_p10)
}
  0x1b   :  { %s1300_s18 = scalar_lea.vmem %s1451_s16, 1024  ;;  %p1305_p12 = scmp.lt.s32.totalorder %s1451_s16, %s1451_s16 }
  0x1c   :  { %p1301_p11 = scmp.ne.s32.totalorder %s1451_s16, %s1300_s18  ;;  %p1306_p13 = scmp.lt.s32.totalorder %s1300_s18, %s1300_s18 }
  0x1e   :  { %p1307_p0 = por %p1306_p13, %p1305_p12 }
  0x20   :  { %p1308_p1 = pnand %p1307_p0, %p1301_p11 }
  0x22   :  { %1311 = shalt.err (!%p1308_p1)
}
  0x23   :  { %30 = dma.hbm_to_vmem [thread:$0]  %s1681_s0, 1024, %s1451_s16, [#allocation3], %s1388_s25, %s1388_s25, %s1389_s26  }
  0x24   :  { %s1390_s19 = smov [#allocation7]   ;;  %s1391_s21 = smov [#allocation8]  }
  0x25   :  { %s54_s20 = sshll.u32 %s1390_s19, 4  ;;  %s72_s22 = sshll.u32 %s1391_s21, 4  ;;  %s55_s20 = int_to_ptr.vmem [resolvable:$true] %s54_s20  ;;  %s1488_s22 = int_to_ptr.vmem [resolvable:$true] %s72_s22 }
  0x26   :  { %s1312_s27 = scalar_lea.hbm %s1686_s5, 2048 }
  0x27   :  { %p1313_p2 = scmp.ne.s32.totalorder %s1686_s5, %s1312_s27  ;;  %p1316_p3 = scmp.lt.u32.totalorder %s1312_s27, %s1686_s5 }
  0x29   :  { %p1318_p4 = pnand %p1316_p3, %p1313_p2 }
  0x2b   :  { %1321 = shalt.err (!%p1318_p4)
}
  0x2c   :  { %s1322_s0 = scalar_lea.vmem %s55_s20, 2048  ;;  %p1327_p6 = scmp.lt.s32.totalorder %s55_s20, %s55_s20 }
  0x2d   :  { %p1323_p5 = scmp.ne.s32.totalorder %s55_s20, %s1322_s0  ;;  %p1328_p7 = scmp.lt.s32.totalorder %s1322_s0, %s1322_s0 }
  0x2f   :  { %p1329_p8 = por %p1328_p7, %p1327_p6 }
  0x31   :  { %p1330_p9 = pnand %p1329_p8, %p1323_p5 }
  0x33   :  { %1333 = shalt.err (!%p1330_p9)
}
  0x34   :  { %60 = dma.hbm_to_vmem [thread:$0]  %s1686_s5, 2048, %s55_s20, [#allocation6], %s1388_s25, %s1388_s25, %s1389_s26  }
  0x35   :  { %s1334_s17 = scalar_lea.hbm %s1690_s9, 1024 }
  0x36   :  { %p1335_p10 = scmp.ne.s32.totalorder %s1690_s9, %s1334_s17  ;;  %p1338_p11 = scmp.lt.u32.totalorder %s1334_s17, %s1690_s9 }
  0x38   :  { %p1340_p12 = pnand %p1338_p11, %p1335_p10 }
  0x3a   :  { %1343 = shalt.err (!%p1340_p12)
}
  0x3b   :  { %s1344_s21 = scalar_lea.vmem %s1488_s22, 1024  ;;  %p1349_p0 = scmp.lt.s32.totalorder %s1488_s22, %s1488_s22 }
  0x3c   :  { %p1345_p13 = scmp.ne.s32.totalorder %s1488_s22, %s1344_s21  ;;  %p1350_p1 = scmp.lt.s32.totalorder %s1344_s21, %s1344_s21 }
  0x3e   :  { %p1351_p2 = por %p1350_p1, %p1349_p0 }
  0x40   :  { %p1352_p3 = pnand %p1351_p2, %p1345_p13 }
  0x42   :  { %1355 = shalt.err (!%p1352_p3)
}
  0x43   :  { %78 = dma.hbm_to_vmem [thread:$0]  %s1690_s9, 1024, %s1488_s22, [#allocation9], %s1388_s25, %s1388_s25, %s1389_s26  }
  0x44   :  { %1378 = dma.done.wait [#allocation3], 1024  }
  0x45   :  { %1379 = vsyncadd [#allocation3], 4294966272 }
  0x46   :  { %1380 = dma.done.wait [#allocation6], 4096  }
  0x47   :  { %1381 = vsyncadd [#allocation6], 4294963200 }
  0x48   :  { %1382 = dma.done.wait [#allocation9], 1024  }
  0x49   :  { %1383 = vsyncadd [#allocation9], 4294966272  ;;  %v108_v0 = vld [vmem:[#allocation5] sm:$0xff]  ;;  %v109_v1 = vld [vmem:[#allocation5 + $0x8] sm:$0xff]  ;;  %v1392_v36 = vmov 0.0|0.0   ;;  %vm1393_vm0 = vmmov 0   ;;  %v304_v62 = vlaneseq }
  0x4a   :  { %v110_v2 = vld [vmem:[#allocation5 + $0x10] sm:$0xff]  ;;  %v131_v3 = vpack.c.bf16 %v109_v1, %v108_v0  ;;  %v111_v4 = vld [vmem:[#allocation5 + $0x18] sm:$0xff]  ;;  %v112_v6 = vld [vmem:[#allocation5 + $0x20] sm:$0xff]  ;;  %1170 = vmatprep.subr.bf16.mxu1 %v1392_v36  ;;  %v1394_v37 = vmov 0.0   ;;  %vm348_vm1 = vcmask 523264   ;;  %s1395_s30 = smov [#allocation10]  }
  0x4b   :  { %v132_v5 = vpack.c.bf16 %v111_v4, %v110_v2  ;;  %v113_v7 = vld [vmem:[#allocation5 + $0x28] sm:$0xff]  ;;  %v100_v9 = vld [vmem:[#allocation2] sm:$0xff]  ;;  %v114_v11 = vld [vmem:[#allocation5 + $0x30] sm:$0xff]  ;;  %1092 = vmatprep.mubr.msk.f32.mxu1 %vm1393_vm0, %v1394_v37  ;;  %v1538_v1 = vshrl.u32 %v304_v62, 7  ;;  %s968_s11 = sshll.u32 %s1395_s30, 4  ;;  %s969_s11 = int_to_ptr.vmem [resolvable:$true] %s968_s11 }
  0x4c   :  { %1052 = vmatprep.subr.bf16.mxu0 %v131_v3  ;;  %v133_v8 = vpack.c.bf16 %v113_v7, %v112_v6  ;;  %v101_v10 = vld [vmem:[#allocation2 + $0x8] sm:$0xff]  ;;  %v115_v12 = vld [vmem:[#allocation5 + $0x38] sm:$0xff]  ;;  %v116_v15 = vld [vmem:[#allocation5 + $0x40] sm:$0xff]  ;;  %p1361_p5 = scmp.lt.s32.totalorder %s969_s11, %s969_s11 }
  0x4d   :  { %1053 = vmatpush3.bf16.msra.mxu0 %v131_v3  ;;  %v127_v13 = vpack.c.bf16 %v101_v10, %v100_v9  ;;  %v134_v14 = vpack.c.bf16 %v115_v12, %v114_v11  ;;  %v117_v16 = vld [vmem:[#allocation5 + $0x48] sm:$0xff]  ;;  %v118_v18 = vld [vmem:[#allocation5 + $0x50] sm:$0xff]  ;;  %v119_v19 = vld [vmem:[#allocation5 + $0x58] sm:$0xff]  ;;  %v306_v4 = vsub.s32 0, %v1538_v1 }
  0x4e   :  { %1054 = vmatprep.subr.bf16.mxu0 %v132_v5  ;;  %v135_v17 = vpack.c.bf16 %v117_v16, %v116_v15  ;;  %v136_v20 = vpack.c.bf16 %v119_v19, %v118_v18  ;;  %v120_v21 = vld [vmem:[#allocation5 + $0x60] sm:$0xff]  ;;  %v121_v22 = vld [vmem:[#allocation5 + $0x68] sm:$0xff]  ;;  %v122_v24 = vld [vmem:[#allocation5 + $0x70] sm:$0xff] }
  0x4f   :  { %1068 = vmatprep.mubr.bf16.mxu0 %v127_v13  ;;  %v137_v23 = vpack.c.bf16 %v121_v22, %v120_v21  ;;  %v123_v25 = vld [vmem:[#allocation5 + $0x78] sm:$0xff]  ;;  %v102_v27 = vld [vmem:[#allocation2 + $0x10] sm:$0xff]  ;;  %v104_v29 = vld [vmem:[#allocation2 + $0x20] sm:$0xff] }
  0x50   :  { %v138_v26 = vpack.c.bf16 %v123_v25, %v122_v24  ;;  %v103_v28 = vld [vmem:[#allocation2 + $0x18] sm:$0xff]  ;;  %v105_v30 = vld [vmem:[#allocation2 + $0x28] sm:$0xff]  ;;  %v106_v33 = vld [vmem:[#allocation2 + $0x30] sm:$0xff] }
  0x51   :  { %1055 = vmatpush3.bf16.msra.mxu0 %v132_v5  ;;  %v128_v31 = vpack.c.bf16 %v103_v28, %v102_v27  ;;  %v129_v32 = vpack.c.bf16 %v105_v30, %v104_v29  ;;  %v107_v34 = vld [vmem:[#allocation2 + $0x38] sm:$0xff]  ;;  %v982_v38 = vld [vmem:[%s1684_s3] ss:$0 sm:$0xff]  ;;  %v1549_v27 = vld [vmem:[#allocation8 + $0x10] sm:$0xff] }
  0x52   :  { %1056 = vmatprep.subr.bf16.mxu0 %v133_v8  ;;  %v130_v35 = vpack.c.bf16 %v107_v34, %v106_v33  ;;  %v124_v59 = vld [vmem:[%s1683_s2] sm:$0x1]  ;;  %v1547_v16 = vld [vmem:[#allocation8 + $0x18] sm:$0xff] }
  0x53   :  { %v1545_v15 = vld [vmem:[#allocation8] sm:$0xff] }
  0x55   :  { %1057 = vmatpush3.bf16.msra.mxu0 %v133_v8 }
  0x56   :  { %1058 = vmatprep.subr.bf16.mxu0 %v134_v14 }
  0x59   :  { %1059 = vmatpush3.bf16.msra.mxu0 %v134_v14  ;;  %v1543_v14 = vld [vmem:[#allocation8 + $0x8] sm:$0xff] }
  0x5a   :  { %1060 = vmatprep.subr.bf16.mxu0 %v135_v17 }
  0x5d   :  { %1061 = vmatpush3.bf16.msra.mxu0 %v135_v17 }
  0x5e   :  { %1062 = vmatprep.subr.bf16.mxu0 %v136_v20 }
  0x61   :  { %1063 = vmatpush3.bf16.msra.mxu0 %v136_v20 }
  0x62   :  { %1064 = vmatprep.subr.bf16.mxu0 %v137_v23 }
  0x65   :  { %1065 = vmatpush3.bf16.msra.mxu0 %v137_v23 }
  0x66   :  { %1066 = vmatprep.subr.bf16.mxu0 %v138_v26 }
  0x69   :  { %1067 = vmatpush3.bf16.msra.mxu0 %v138_v26 }
  0x6c   :  { %1069 = vmatmul.mubr.bf16.vlgmr.msra.gmra.mrb[0].mxu0 %v128_v31 }
  0x6d   :  { %1072 = vmatprep.mubr.bf16.mxu0 %v129_v32 }
  0x74   :  { %1073 = vmatmul.mubr.bf16.gmra.mrb[4].mxu0 %v130_v35 }
 0x13f   :  { %v1070_v39 = vpop.f32.mrb[0].mxu0 }
 0x140   :  { %v173_v40 = vpop.f32.mrb[1].mxu0  ;;  %v212_v41 = vmul.f32 %v1070_v39, %v982_v38 }
 0x141   :  { %v1071_v42 = vpop.f32.mrb[2].mxu0  ;;  %v210_v43 = vmul.f32 %v982_v38, %v173_v40 }
 0x142   :  { %v1174_v44 = vpack.c.bf16 %v1071_v42, %v1070_v39  ;;  %222 = vadd.xlane.f32.xlu1 %v212_v41  ;;  %v176_v45 = vpop.f32.mrb[3].mxu0  ;;  %v213_v47 = vmul.f32 %v1071_v42, %v982_v38  ;;  %v1559_v42 = vld [vmem:[#allocation8 + $0x20] sm:$0xff] }
 0x143   :  { %v1171_v46 = vpack.c.bf16 %v176_v45, %v173_v40  ;;  %218 = vadd.xlane.f32.xlu0 %v210_v43  ;;  %v211_v48 = vmul.f32 %v982_v38, %v176_v45  ;;  %v1557_v40 = vld [vmem:[#allocation8 + $0x28] sm:$0xff] }
 0x145   :  { %1172 = vmatpush3.bf16.xpose.msra.mxu1 %v1171_v46  ;;  %1095 = vmatprep.subr.bf16.mxu0 %v1171_v46 }
 0x146   :  { %224 = vadd.xlane.f32.xlu1 %v213_v47  ;;  %1096 = vmatpush3.bf16.msra.mxu0 %v1171_v46 }
 0x147   :  { %1097 = vmatprep.subr.bf16.mxu0 %v1174_v44  ;;  %220 = vadd.xlane.f32.xlu0 %v211_v48  ;;  %v1074_v49 = vpop.f32.mrb[4].mxu0 }
 0x148   :  { %v189_v50 = vpop.f32.mrb[5].mxu0  ;;  %1173 = vmatprep.subr.bf16.mxu1 %v1392_v36  ;;  %v216_v57 = vmul.f32 %v1074_v49, %v982_v38 }
 0x149   :  { %v1075_v51 = vpop.f32.mrb[6].mxu0  ;;  %v214_v52 = vmul.f32 %v982_v38, %v189_v50 }
 0x14a   :  { %v1180_v53 = vpack.c.bf16 %v1075_v51, %v1074_v49  ;;  %v192_v54 = vpop.f32.mrb[7].mxu0  ;;  %1098 = vmatpush3.bf16.msra.mxu0 %v1174_v44  ;;  %v217_v58 = vmul.f32 %v1075_v51, %v982_v38 }
 0x14b   :  { %v1177_v55 = vpack.c.bf16 %v192_v54, %v189_v50  ;;  %226 = vadd.xlane.f32.xlu0 %v214_v52  ;;  %v215_v56 = vmul.f32 %v982_v38, %v192_v54  ;;  %v1565_v50 = vld [vmem:[#allocation8 + $0x38] sm:$0xff]  ;;  %v1567_v52 = vld [vmem:[#allocation8 + $0x30] sm:$0xff] }
 0x14d   :  { %1175 = vmatpush3.bf16.xpose.msra.mxu1 %v1174_v44  ;;  %1099 = vmatprep.subr.bf16.mxu0 %v1177_v55 }
 0x14e   :  { %1100 = vmatpush3.bf16.msra.mxu0 %v1177_v55  ;;  %228 = vadd.xlane.f32.xlu1 %v215_v56 }
 0x14f   :  { %1101 = vmatprep.subr.bf16.mxu0 %v1180_v53  ;;  %230 = vadd.xlane.f32.xlu0 %v216_v57 }
 0x150   :  { %1176 = vmatprep.subr.bf16.mxu1 %v1392_v36 }
 0x152   :  { %1102 = vmatpush3.bf16.msra.mxu0 %v1180_v53  ;;  %232 = vadd.xlane.f32.xlu1 %v217_v58 }
 0x153   :  { %1182 = vmatprep.subr.bf16.mxu0 %v1392_v36 }
 0x155   :  { %1178 = vmatpush3.bf16.xpose.msra.mxu1 %v1177_v55 }
 0x156   :  { %1179 = vmatprep.subr.bf16.mxu1 %v1392_v36 }
 0x15d   :  { %1181 = vmatpush3.bf16.xpose.msra.mxu1 %v1180_v53 }
 0x164   :  { %1093 = vmatmul.mubr.f32.vlgmr.msra.gmra.mrb[0].mxu1 %v124_v59 }
 0x1cf   :  { %v223_v60 = vpop.xlane.xlu1 %222 }
 0x1d0   :  { %v219_v61 = vpop.xlane.xlu0 %218 }
 0x1d3   :  { %v225_v63 = vpop.xlane.xlu1 %224 }
 0x1d4   :  { %v221_v0 = vpop.xlane.xlu0 %220 }
 0x1d8   :  { %v227_v2 = vpop.xlane.xlu0 %226 }
 0x1db   :  { %v229_v3 = vpop.xlane.xlu1 %228 }
 0x1dc   :  { %v231_v8 = vpop.xlane.xlu0 %230 }
 0x1df   :  { %v233_v9 = vpop.xlane.xlu1 %232 }
 0x237   :  { %v300_v5 = vpop.f32.mrb[0].mxu1 }
 0x238   :  { %v307_v6 = vrot.slane %v300_v5, %v306_v4  ;;  %v1094_v7 = vpop.f32.mrb[1].mxu1 }
 0x23a   :  { %v309_v10 = vadd.f32 %v307_v6, %v221_v0  ;;  %v308_v11 = vadd.f32 %v307_v6, %v219_v61  ;;  %v311_v12 = vadd.f32 %v307_v6, %v225_v63  ;;  %v310_v13 = vadd.f32 %v307_v6, %v223_v60 }
 0x23b   :  { %v313_v17 = vadd.f32 %v307_v6, %v229_v3  ;;  %v312_v18 = vadd.f32 %v307_v6, %v227_v2  ;;  %v315_v19 = vadd.f32 %v307_v6, %v233_v9  ;;  %v314_v20 = vadd.f32 %v307_v6, %v231_v8 }
 0x23c   :  { %vm317_vm2 = vcmp.gt.f32.partialorder %v309_v10, 0.0  ;;  %v325_v21 = vmul.f32 0.2, %v309_v10  ;;  %vm316_vm3 = vcmp.gt.f32.partialorder %v308_v11, 0.0  ;;  %v324_v22 = vmul.f32 0.2, %v308_v11 }
 0x23d   :  { %vm319_vm4 = vcmp.gt.f32.partialorder %v311_v12, 0.0  ;;  %v327_v23 = vmul.f32 0.2, %v311_v12  ;;  %vm318_vm5 = vcmp.gt.f32.partialorder %v310_v13, 0.0  ;;  %v326_v24 = vmul.f32 0.2, %v310_v13 }
 0x23e   :  { %v333_v25 = vsel %vm317_vm2, %v309_v10, %v325_v21  ;;  %v332_v26 = vsel %vm316_vm3, %v308_v11, %v324_v22  ;;  %vm321_vm6 = vcmp.gt.f32.partialorder %v313_v17, 0.0  ;;  %v329_v28 = vmul.f32 0.2, %v313_v17 }
 0x23f   :  { %v341_v29 = vadd.f32 %v333_v25, %v1543_v14  ;;  %v340_v30 = vadd.f32 %v332_v26, %v1545_v15  ;;  %v335_v31 = vsel %vm319_vm4, %v311_v12, %v327_v23  ;;  %v334_v32 = vsel %vm318_vm5, %v310_v13, %v326_v24 }
 0x240   :  { %v343_v33 = vadd.f32 %v335_v31, %v1547_v16  ;;  %vm320_vm7 = vcmp.gt.f32.partialorder %v312_v18, 0.0  ;;  %v342_v38 = vadd.f32 %v334_v32, %v1549_v27  ;;  %v328_v39 = vmul.f32 0.2, %v312_v18 }
 0x241   :  { %v352_v34 = vsel %vm348_vm1, %v341_v29, -inf  ;;  %v349_v35 = vsel %vm348_vm1, %v340_v30, -inf  ;;  %v337_v41 = vsel %vm321_vm6, %v313_v17, %v329_v28  ;;  %v331_v43 = vmul.f32 0.2, %v315_v19 }
 0x242   :  { %353 = vmax.xlane.f32.xlu1 %v352_v34  ;;  %350 = vmax.xlane.f32.xlu0 %v349_v35  ;;  %v336_v44 = vsel %vm320_vm7, %v312_v18, %v328_v39  ;;  %vm323_vm8 = vcmp.gt.f32.partialorder %v315_v19, 0.0  ;;  %vm322_vm9 = vcmp.gt.f32.partialorder %v314_v20, 0.0  ;;  %v330_v45 = vmul.f32 0.2, %v314_v20 }
 0x243   :  { %v358_v46 = vsel %vm348_vm1, %v343_v33, -inf  ;;  %v355_v47 = vsel %vm348_vm1, %v342_v38, -inf  ;;  %v345_v48 = vadd.f32 %v337_v41, %v1557_v40  ;;  %v344_v49 = vadd.f32 %v336_v44, %v1559_v42 }
 0x244   :  { %v339_v51 = vsel %vm323_vm8, %v315_v19, %v331_v43  ;;  %v338_v53 = vsel %vm322_vm9, %v314_v20, %v330_v45 }
 0x245   :  { %v364_v54 = vsel %vm348_vm1, %v345_v48, -inf  ;;  %v361_v55 = vsel %vm348_vm1, %v344_v49, -inf  ;;  %v347_v56 = vadd.f32 %v339_v51, %v1565_v50  ;;  %v346_v57 = vadd.f32 %v338_v53, %v1567_v52  ;;  %v539_v51 = vld [vmem:[#allocation7 + $0x18] sm:$0xff] }
 0x246   :  { %359 = vmax.xlane.f32.xlu1 %v358_v46  ;;  %356 = vmax.xlane.f32.xlu0 %v355_v47  ;;  %v536_v46 = vld [vmem:[#allocation7] sm:$0xff]  ;;  %v537_v47 = vld [vmem:[#allocation7 + $0x8] sm:$0xff] }
 0x247   :  { %v370_v58 = vsel %vm348_vm1, %v347_v56, -inf  ;;  %v367_v59 = vsel %vm348_vm1, %v346_v57, -inf }
 0x24a   :  { %365 = vmax.xlane.f32.xlu1 %v364_v54  ;;  %362 = vmax.xlane.f32.xlu0 %v361_v55  ;;  %v540_v54 = vld [vmem:[#allocation7 + $0x20] sm:$0xff]  ;;  %v541_v55 = vld [vmem:[#allocation7 + $0x28] sm:$0xff] }
 0x24e   :  { %371 = vmax.xlane.f32.xlu1 %v370_v58  ;;  %368 = vmax.xlane.f32.xlu0 %v367_v59  ;;  %v543_v58 = vld [vmem:[#allocation7 + $0x38] sm:$0xff] }
 0x2cf   :  { %v354_v60 = vpop.xlane.xlu1 %353  ;;  %v351_v61 = vpop.xlane.xlu0 %350 }
 0x2d0   :  { %v374_v62 = vsub.f32 %v341_v29, %v354_v60  ;;  %v373_v63 = vsub.f32 %v340_v30, %v351_v61  ;;  %v544_v60 = vld [vmem:[#allocation7 + $0x40] sm:$0xff]  ;;  %v545_v61 = vld [vmem:[#allocation7 + $0x48] sm:$0xff] }
 0x2d2   :  { %v383_v0 = vmul.f32 1.442695, %v374_v62  ;;  %v381_v2 = vmul.f32 1.442695, %v373_v63  ;;  %v563_v62 = vpack.c.bf16 %v545_v61, %v544_v60  ;;  %v546_v63 = vld [vmem:[#allocation7 + $0x50] sm:$0xff] }
 0x2d3   :  { %v360_v3 = vpop.xlane.xlu1 %359  ;;  %v357_v5 = vpop.xlane.xlu0 %356 }
 0x2d4   :  { %1204 = vpow2.f32 %v383_v0  ;;  %v376_v6 = vsub.f32 %v343_v33, %v360_v3  ;;  %v375_v7 = vsub.f32 %v342_v38, %v357_v5  ;;  %v547_v0 = vld [vmem:[#allocation7 + $0x58] sm:$0xff] }
 0x2d5   :  { %1206 = vpow2.f32 %v381_v2  ;;  %v564_v2 = vpack.c.bf16 %v547_v0, %v546_v63 }
 0x2d6   :  { %v387_v8 = vmul.f32 1.442695, %v376_v6  ;;  %v385_v9 = vmul.f32 1.442695, %v375_v7 }
 0x2d7   :  { %v366_v10 = vpop.xlane.xlu1 %365  ;;  %v363_v11 = vpop.xlane.xlu0 %362 }
 0x2d8   :  { %1208 = vpow2.f32 %v387_v8  ;;  %v378_v12 = vsub.f32 %v345_v48, %v366_v10  ;;  %v377_v13 = vsub.f32 %v344_v49, %v363_v11  ;;  %v538_v48 = vld [vmem:[#allocation7 + $0x10] sm:$0xff]  ;;  %v559_v49 = vpack.c.bf16 %v537_v47, %v536_v46 }
 0x2d9   :  { %1210 = vpow2.f32 %v385_v9  ;;  %v560_v53 = vpack.c.bf16 %v539_v51, %v538_v48  ;;  %v550_v46 = vld [vmem:[#allocation7 + $0x70] sm:$0xff] }
 0x2da   :  { %v391_v17 = vmul.f32 1.442695, %v378_v12  ;;  %v389_v18 = vmul.f32 1.442695, %v377_v13  ;;  %1111 = vmatprep.subr.bf16.mxu1 %v559_v49 }
 0x2db   :  { %v372_v19 = vpop.xlane.xlu1 %371  ;;  %v369_v20 = vpop.xlane.xlu0 %368  ;;  %1112 = vmatpush3.bf16.msra.mxu1 %v559_v49 }
 0x2dc   :  { %1212 = vpow2.f32 %v391_v17  ;;  %v380_v21 = vsub.f32 %v347_v56, %v372_v19  ;;  %v379_v22 = vsub.f32 %v346_v57, %v369_v20  ;;  %1113 = vmatprep.subr.bf16.mxu1 %v560_v53  ;;  %v561_v56 = vpack.c.bf16 %v541_v55, %v540_v54  ;;  %v542_v57 = vld [vmem:[#allocation7 + $0x30] sm:$0xff] }
 0x2dd   :  { %1214 = vpow2.f32 %v389_v18  ;;  %v562_v59 = vpack.c.bf16 %v543_v58, %v542_v57 }
 0x2de   :  { %v1575_v23 = vpop.eup %1204  ;;  %v395_v24 = vmul.f32 1.442695, %v380_v21  ;;  %v393_v25 = vmul.f32 1.442695, %v379_v22 }
 0x2df   :  { %v1577_v26 = vpop.eup %1206  ;;  %v400_v28 = vsel %vm348_vm1, %v1575_v23, 0.0  ;;  %1114 = vmatpush3.bf16.msra.mxu1 %v560_v53 }
 0x2e0   :  { %1216 = vpow2.f32 %v395_v24  ;;  %401 = vadd.xlane.f32.xlu1 %v400_v28  ;;  %v397_v29 = vsel %vm348_vm1, %v1577_v26, 0.0  ;;  %1115 = vmatprep.subr.bf16.mxu1 %v561_v56 }
 0x2e1   :  { %1218 = vpow2.f32 %v393_v25  ;;  %398 = vadd.xlane.f32.xlu0 %v397_v29 }
 0x2e2   :  { %v1583_v30 = vpop.eup %1208 }
 0x2e3   :  { %v1585_v31 = vpop.eup %1210  ;;  %v406_v32 = vsel %vm348_vm1, %v1583_v30, 0.0  ;;  %1116 = vmatpush3.bf16.msra.mxu1 %v561_v56 }
 0x2e4   :  { %407 = vadd.xlane.f32.xlu1 %v406_v32  ;;  %v403_v33 = vsel %vm348_vm1, %v1585_v31, 0.0  ;;  %1117 = vmatprep.subr.bf16.mxu1 %v562_v59 }
 0x2e5   :  { %404 = vadd.xlane.f32.xlu0 %v403_v33 }
 0x2e6   :  { %v1591_v34 = vpop.eup %1212 }
 0x2e7   :  { %v1593_v35 = vpop.eup %1214  ;;  %v412_v38 = vsel %vm348_vm1, %v1591_v34, 0.0  ;;  %1118 = vmatpush3.bf16.msra.mxu1 %v562_v59 }
 0x2e8   :  { %413 = vadd.xlane.f32.xlu1 %v412_v38  ;;  %v409_v39 = vsel %vm348_vm1, %v1593_v35, 0.0  ;;  %1119 = vmatprep.subr.bf16.mxu1 %v563_v62 }
 0x2e9   :  { %410 = vadd.xlane.f32.xlu0 %v409_v39 }
 0x2ea   :  { %v1599_v41 = vpop.eup %1216 }
 0x2eb   :  { %v1601_v43 = vpop.eup %1218  ;;  %v418_v44 = vsel %vm348_vm1, %v1599_v41, 0.0  ;;  %1120 = vmatpush3.bf16.msra.mxu1 %v563_v62 }
 0x2ec   :  { %419 = vadd.xlane.f32.xlu1 %v418_v44  ;;  %v415_v45 = vsel %vm348_vm1, %v1601_v43, 0.0  ;;  %1121 = vmatprep.subr.bf16.mxu1 %v564_v2  ;;  %v549_v44 = vld [vmem:[#allocation7 + $0x68] sm:$0xff] }
 0x2ed   :  { %416 = vadd.xlane.f32.xlu0 %v415_v45 }
 0x2ef   :  { %1122 = vmatpush3.bf16.msra.mxu1 %v564_v2 }
 0x36d   :  { %v402_v3 = vpop.xlane.xlu1 %401 }
 0x36e   :  { %1220 = vrcp.f32 %v402_v3  ;;  %v399_v5 = vpop.xlane.xlu0 %398 }
 0x36f   :  { %1222 = vrcp.f32 %v399_v5 }
 0x371   :  { %v408_v6 = vpop.xlane.xlu1 %407 }
 0x372   :  { %1224 = vrcp.f32 %v408_v6  ;;  %v405_v7 = vpop.xlane.xlu0 %404 }
 0x373   :  { %1226 = vrcp.f32 %v405_v7 }
 0x375   :  { %v414_v8 = vpop.xlane.xlu1 %413 }
 0x376   :  { %1228 = vrcp.f32 %v414_v8  ;;  %v411_v9 = vpop.xlane.xlu0 %410 }
 0x377   :  { %1230 = vrcp.f32 %v411_v9 }
 0x378   :  { %v1221_v10 = vpop.eup %1220 }
 0x379   :  { %v1223_v11 = vpop.eup %1222  ;;  %v420_v12 = vpop.xlane.xlu1 %419  ;;  %v430_v13 = vmul.f32 %v1221_v10, %v1575_v23 }
 0x37a   :  { %1232 = vrcp.f32 %v420_v12  ;;  %v417_v17 = vpop.xlane.xlu0 %416  ;;  %v429_v18 = vmul.f32 %v1223_v11, %v1577_v26 }
 0x37b   :  { %1234 = vrcp.f32 %v417_v17  ;;  %v988_v17 = vld [vmem:[%s1688_s7] ss:$0 sm:$0xff] }
 0x37c   :  { %v1225_v19 = vpop.eup %1224  ;;  %v437_v20 = vpack.c.bf16 %v430_v13, %v429_v18 }
 0x37d   :  { %v1227_v21 = vpop.eup %1226  ;;  %v432_v22 = vmul.f32 %v1225_v19, %v1583_v30 }
 0x37e   :  { %v431_v24 = vmul.f32 %v1227_v21, %v1585_v31  ;;  %1103 = vmatprep.mubr.msk.bf16.mxu0 %vm348_vm1, %v437_v20 }
 0x380   :  { %v1229_v25 = vpop.eup %1228  ;;  %v438_v28 = vpack.c.bf16 %v432_v22, %v431_v24 }
 0x381   :  { %v1231_v29 = vpop.eup %1230  ;;  %v434_v32 = vmul.f32 %v1229_v25, %v1591_v34  ;;  %v548_v34 = vld [vmem:[#allocation7 + $0x60] sm:$0xff] }
 0x382   :  { %1104 = vmatmul.mubr.msk.bf16.vlgmr.msra.gmra.mrb[8].mxu0 %vm348_vm1, %v438_v28  ;;  %v433_v23 = vmul.f32 %v1231_v29, %v1593_v35  ;;  %v565_v45 = vpack.c.bf16 %v549_v44, %v548_v34  ;;  %v551_v35 = vld [vmem:[#allocation7 + $0x78] sm:$0xff] }
 0x383   :  { %v566_v47 = vpack.c.bf16 %v551_v35, %v550_v46  ;;  %v552_v46 = vld [vmem:[%s1687_s6] sm:$0x1] }
 0x384   :  { %v1233_v26 = vpop.eup %1232  ;;  %v439_v33 = vpack.c.bf16 %v434_v32, %v433_v23  ;;  %1123 = vmatprep.subr.bf16.mxu1 %v565_v45 }
 0x385   :  { %v1235_v38 = vpop.eup %1234  ;;  %v436_v39 = vmul.f32 %v1233_v26, %v1599_v41  ;;  %1124 = vmatpush3.bf16.msra.mxu1 %v565_v45  ;;  %v983_v41 = vld [vmem:[%s1685_s4] ss:$0 sm:$0xff] }
 0x386   :  { %1107 = vmatprep.mubr.msk.bf16.mxu0 %vm348_vm1, %v439_v33  ;;  %v435_v30 = vmul.f32 %v1235_v38, %v1601_v43  ;;  %1125 = vmatprep.subr.bf16.mxu1 %v566_v47 }
 0x388   :  { %v440_v31 = vpack.c.bf16 %v436_v39, %v435_v30 }
 0x389   :  { %1126 = vmatpush3.bf16.msra.mxu1 %v566_v47 }
 0x38a   :  { %1108 = vmatmul.mubr.msk.bf16.gmra.mrb[12].mxu0 %vm348_vm1, %v440_v31 }
 0x38b   :  { %1151 = vmatprep.mubr.msk.f32.mxu0 %vm1393_vm0, %v1394_v37 }
 0x455   :  { %v1105_v43 = vpop.f32.mrb[8].mxu0 }
 0x456   :  { %v506_v48 = vadd.f32 %v1105_v43, %v983_v41  ;;  %v497_v49 = vpop.f32.mrb[9].mxu0 }
 0x457   :  { %v498_v51 = vadd.f32 %v983_v41, %v497_v49  ;;  %v1106_v53 = vpop.f32.mrb[10].mxu0 }
 0x458   :  { %v509_v37 = vadd.f32 %v1106_v53, %v983_v41  ;;  %v500_v54 = vpop.f32.mrb[11].mxu0  ;;  %v530_v56 = vmax.f32 %v506_v48, 0.0 }
 0x459   :  { %v501_v55 = vadd.f32 %v983_v41, %v500_v54  ;;  %v528_v58 = vmax.f32 %v498_v51, 0.0 }
 0x45a   :  { %v531_v57 = vmax.f32 %v509_v37, 0.0 }
 0x45b   :  { %v529_v59 = vmax.f32 %v501_v55, 0.0 }
 0x45c   :  { %v556_v60 = vpack.c.bf16 %v531_v57, %v530_v56 }
 0x45d   :  { %v555_v61 = vpack.c.bf16 %v529_v59, %v528_v58  ;;  %v1109_v62 = vpop.f32.mrb[12].mxu0 }
 0x45e   :  { %v522_v63 = vadd.f32 %v1109_v62, %v983_v41  ;;  %v513_v0 = vpop.f32.mrb[13].mxu0 }
 0x45f   :  { %v514_v2 = vadd.f32 %v983_v41, %v513_v0  ;;  %v1110_v3 = vpop.f32.mrb[14].mxu0  ;;  %1127 = vmatprep.mubr.bf16.mxu1 %v555_v61 }
 0x460   :  { %v525_v5 = vadd.f32 %v1110_v3, %v983_v41  ;;  %v516_v6 = vpop.f32.mrb[15].mxu0  ;;  %1128 = vmatmul.mubr.bf16.vlgmr.msra.gmra.mrb[4].mxu1 %v556_v60  ;;  %v534_v8 = vmax.f32 %v522_v63, 0.0 }
 0x461   :  { %v517_v7 = vadd.f32 %v983_v41, %v516_v6  ;;  %v532_v10 = vmax.f32 %v514_v2, 0.0 }
 0x462   :  { %v535_v9 = vmax.f32 %v525_v5, 0.0 }
 0x463   :  { %v533_v11 = vmax.f32 %v517_v7, 0.0 }
 0x464   :  { %v558_v12 = vpack.c.bf16 %v535_v9, %v534_v8 }
 0x465   :  { %v557_v13 = vpack.c.bf16 %v533_v11, %v532_v10 }
 0x467   :  { %1131 = vmatprep.mubr.bf16.mxu1 %v557_v13 }
 0x468   :  { %1132 = vmatmul.mubr.bf16.gmra.mrb[8].mxu1 %v558_v12 }
 0x533   :  { %v1129_v18 = vpop.f32.mrb[4].mxu1 }
 0x534   :  { %v601_v19 = vpop.f32.mrb[5].mxu1  ;;  %v640_v29 = vmul.f32 %v1129_v18, %v988_v17 }
 0x535   :  { %v1130_v20 = vpop.f32.mrb[6].mxu1  ;;  %v638_v21 = vmul.f32 %v988_v17, %v601_v19 }
 0x536   :  { %v1186_v22 = vpack.c.bf16 %v1130_v20, %v1129_v18  ;;  %v604_v24 = vpop.f32.mrb[7].mxu1  ;;  %v641_v26 = vmul.f32 %v1130_v20, %v988_v17 }
 0x537   :  { %v1183_v25 = vpack.c.bf16 %v604_v24, %v601_v19  ;;  %646 = vadd.xlane.f32.xlu0 %v638_v21  ;;  %v639_v28 = vmul.f32 %v988_v17, %v604_v24 }
 0x539   :  { %1184 = vmatpush3.bf16.xpose.msra.mxu0 %v1183_v25  ;;  %1154 = vmatprep.subr.bf16.mxu1 %v1183_v25 }
 0x53a   :  { %648 = vadd.xlane.f32.xlu1 %v639_v28  ;;  %1155 = vmatpush3.bf16.msra.mxu1 %v1183_v25 }
 0x53b   :  { %650 = vadd.xlane.f32.xlu0 %v640_v29  ;;  %v1133_v32 = vpop.f32.mrb[8].mxu1  ;;  %1156 = vmatprep.subr.bf16.mxu1 %v1186_v22 }
 0x53c   :  { %v617_v23 = vpop.f32.mrb[9].mxu1  ;;  %1185 = vmatprep.subr.bf16.mxu0 %v1392_v36  ;;  %v644_v44 = vmul.f32 %v1133_v32, %v988_v17 }
 0x53d   :  { %v1134_v33 = vpop.f32.mrb[10].mxu1  ;;  %v642_v38 = vmul.f32 %v988_v17, %v617_v23 }
 0x53e   :  { %652 = vadd.xlane.f32.xlu1 %v641_v26  ;;  %v1192_v39 = vpack.c.bf16 %v1134_v33, %v1133_v32  ;;  %v620_v30 = vpop.f32.mrb[11].mxu1  ;;  %1157 = vmatpush3.bf16.msra.mxu1 %v1186_v22  ;;  %v645_v45 = vmul.f32 %v1134_v33, %v988_v17 }
 0x53f   :  { %v1189_v31 = vpack.c.bf16 %v620_v30, %v617_v23  ;;  %654 = vadd.xlane.f32.xlu0 %v642_v38  ;;  %v643_v34 = vmul.f32 %v988_v17, %v620_v30 }
 0x541   :  { %1187 = vmatpush3.bf16.xpose.msra.mxu0 %v1186_v22  ;;  %1158 = vmatprep.subr.bf16.mxu1 %v1189_v31 }
 0x542   :  { %656 = vadd.xlane.f32.xlu1 %v643_v34  ;;  %1159 = vmatpush3.bf16.msra.mxu1 %v1189_v31 }
 0x543   :  { %658 = vadd.xlane.f32.xlu0 %v644_v44  ;;  %1160 = vmatprep.subr.bf16.mxu1 %v1192_v39 }
 0x544   :  { %1188 = vmatprep.subr.bf16.mxu0 %v1392_v36 }
 0x546   :  { %660 = vadd.xlane.f32.xlu1 %v645_v45  ;;  %1161 = vmatpush3.bf16.msra.mxu1 %v1192_v39 }
 0x549   :  { %1190 = vmatpush3.bf16.xpose.msra.mxu0 %v1189_v31 }
 0x54a   :  { %1191 = vmatprep.subr.bf16.mxu0 %v1392_v36 }
 0x551   :  { %1193 = vmatpush3.bf16.xpose.msra.mxu0 %v1192_v39 }
 0x558   :  { %1152 = vmatmul.mubr.f32.vlgmr.msra.gmra.mrb[16].mxu0 %v552_v46 }
 0x5c4   :  { %v647_v35 = vpop.xlane.xlu0 %646 }
 0x5c7   :  { %v649_v47 = vpop.xlane.xlu1 %648 }
 0x5c8   :  { %v651_v41 = vpop.xlane.xlu0 %650 }
 0x5cb   :  { %v653_v43 = vpop.xlane.xlu1 %652 }
 0x5cc   :  { %v655_v48 = vpop.xlane.xlu0 %654 }
 0x5cf   :  { %v657_v49 = vpop.xlane.xlu1 %656 }
 0x5d0   :  { %v659_v54 = vpop.xlane.xlu0 %658 }
 0x5d3   :  { %v661_v55 = vpop.xlane.xlu1 %660 }
 0x62b   :  { %v728_v51 = vpop.f32.mrb[16].mxu0 }
 0x62c   :  { %v735_v53 = vrot.slane %v728_v51, %v306_v4  ;;  %v1153_v37 = vpop.f32.mrb[17].mxu0 }
 0x62e   :  { %v737_v36 = vadd.f32 %v735_v53, %v649_v47  ;;  %v736_v56 = vadd.f32 %v735_v53, %v647_v35  ;;  %v739_v57 = vadd.f32 %v735_v53, %v653_v43  ;;  %v738_v58 = vadd.f32 %v735_v53, %v651_v41 }
 0x62f   :  { %v741_v59 = vadd.f32 %v735_v53, %v657_v49  ;;  %v740_v60 = vadd.f32 %v735_v53, %v655_v48  ;;  %v743_v61 = vadd.f32 %v735_v53, %v661_v55  ;;  %v742_v62 = vadd.f32 %v735_v53, %v659_v54 }
 0x630   :  { %vm745_vm10 = vcmp.gt.f32.partialorder %v737_v36, 0.0  ;;  %v753_v63 = vmul.f32 0.2, %v737_v36  ;;  %vm744_vm11 = vcmp.gt.f32.partialorder %v736_v56, 0.0  ;;  %v752_v0 = vmul.f32 0.2, %v736_v56 }
 0x631   :  { %vm747_vm12 = vcmp.gt.f32.partialorder %v739_v57, 0.0  ;;  %v755_v2 = vmul.f32 0.2, %v739_v57  ;;  %vm746_vm13 = vcmp.gt.f32.partialorder %v738_v58, 0.0  ;;  %v754_v1 = vmul.f32 0.2, %v738_v58 }
 0x632   :  { %v761_v4 = vsel %vm745_vm10, %v737_v36, %v753_v63  ;;  %v760_v3 = vsel %vm744_vm11, %v736_v56, %v752_v0  ;;  %vm749_vm14 = vcmp.gt.f32.partialorder %v741_v59, 0.0  ;;  %v757_v5 = vmul.f32 0.2, %v741_v59 }
 0x633   :  { %v769_v6 = vadd.f32 %v761_v4, %v1543_v14  ;;  %v768_v7 = vadd.f32 %v760_v3, %v1545_v15  ;;  %v763_v8 = vsel %vm747_vm12, %v739_v57, %v755_v2  ;;  %v762_v9 = vsel %vm746_vm13, %v738_v58, %v754_v1 }
 0x634   :  { %v771_v10 = vadd.f32 %v763_v8, %v1547_v16  ;;  %vm748_vm15 = vcmp.gt.f32.partialorder %v740_v60, 0.0  ;;  %v770_v13 = vadd.f32 %v762_v9, %v1549_v27  ;;  %v756_v17 = vmul.f32 0.2, %v740_v60 }
 0x635   :  { %v779_v11 = vsel %vm348_vm1, %v769_v6, -inf  ;;  %v776_v12 = vsel %vm348_vm1, %v768_v7, -inf  ;;  %v765_v18 = vsel %vm749_vm14, %v741_v59, %v757_v5  ;;  %v759_v19 = vmul.f32 0.2, %v743_v61 }
 0x636   :  { %780 = vmax.xlane.f32.xlu1 %v779_v11  ;;  %777 = vmax.xlane.f32.xlu0 %v776_v12  ;;  %v764_v20 = vsel %vm748_vm15, %v740_v60, %v756_v17  ;;  %vm751_vm0 = vcmp.gt.f32.partialorder %v743_v61, 0.0  ;;  %vm750_vm2 = vcmp.gt.f32.partialorder %v742_v62, 0.0  ;;  %v758_v14 = vmul.f32 0.2, %v742_v62 }
 0x637   :  { %v785_v15 = vsel %vm348_vm1, %v771_v10, -inf  ;;  %v782_v16 = vsel %vm348_vm1, %v770_v13, -inf  ;;  %v773_v21 = vadd.f32 %v765_v18, %v1557_v40  ;;  %v772_v22 = vadd.f32 %v764_v20, %v1559_v42 }
 0x638   :  { %v767_v27 = vsel %vm751_vm0, %v743_v61, %v759_v19  ;;  %v766_v24 = vsel %vm750_vm2, %v742_v62, %v758_v14 }
 0x639   :  { %v791_v25 = vsel %vm348_vm1, %v773_v21, -inf  ;;  %v788_v28 = vsel %vm348_vm1, %v772_v22, -inf  ;;  %v775_v29 = vadd.f32 %v767_v27, %v1565_v50  ;;  %v774_v32 = vadd.f32 %v766_v24, %v1567_v52 }
 0x63a   :  { %786 = vmax.xlane.f32.xlu1 %v785_v15  ;;  %783 = vmax.xlane.f32.xlu0 %v782_v16 }
 0x63b   :  { %v797_v23 = vsel %vm348_vm1, %v775_v29, -inf  ;;  %v794_v40 = vsel %vm348_vm1, %v774_v32, -inf }
 0x63e   :  { %792 = vmax.xlane.f32.xlu1 %v791_v25  ;;  %789 = vmax.xlane.f32.xlu0 %v788_v28 }
 0x642   :  { %798 = vmax.xlane.f32.xlu1 %v797_v23  ;;  %795 = vmax.xlane.f32.xlu0 %v794_v40 }
 0x6c3   :  { %v781_v42 = vpop.xlane.xlu1 %780  ;;  %v778_v26 = vpop.xlane.xlu0 %777 }
 0x6c4   :  { %v801_v33 = vsub.f32 %v769_v6, %v781_v42  ;;  %v800_v38 = vsub.f32 %v768_v7, %v778_v26 }
 0x6c6   :  { %v810_v39 = vmul.f32 1.442695, %v801_v33  ;;  %v808_v30 = vmul.f32 1.442695, %v800_v38 }
 0x6c7   :  { %v787_v31 = vpop.xlane.xlu1 %786  ;;  %v784_v34 = vpop.xlane.xlu0 %783 }
 0x6c8   :  { %1236 = vpow2.f32 %v810_v39  ;;  %v803_v50 = vsub.f32 %v771_v10, %v787_v31  ;;  %v802_v44 = vsub.f32 %v770_v13, %v784_v34  ;;  %v989_v39 = vld [vmem:[%s1689_s8] ss:$0 sm:$0xff]  ;;  %s1356_s8 = scalar_lea.vmem %s969_s11, 1024 }
 0x6c9   :  { %1238 = vpow2.f32 %v808_v30  ;;  %p1357_p4 = scmp.ne.s32.totalorder %s969_s11, %s1356_s8  ;;  %p1362_p6 = scmp.lt.s32.totalorder %s1356_s8, %s1356_s8 }
 0x6ca   :  { %v814_v52 = vmul.f32 1.442695, %v803_v50  ;;  %v812_v45 = vmul.f32 1.442695, %v802_v44 }
 0x6cb   :  { %v793_v46 = vpop.xlane.xlu1 %792  ;;  %v790_v35 = vpop.xlane.xlu0 %789  ;;  %p1363_p7 = por %p1362_p6, %p1361_p5 }
 0x6cc   :  { %1240 = vpow2.f32 %v814_v52  ;;  %v805_v47 = vsub.f32 %v773_v21, %v793_v46  ;;  %v804_v41 = vsub.f32 %v772_v22, %v790_v35 }
 0x6cd   :  { %1242 = vpow2.f32 %v812_v45  ;;  %p1364_p8 = pnand %p1363_p7, %p1357_p4 }
 0x6ce   :  { %v818_v43 = vmul.f32 1.442695, %v805_v47  ;;  %v816_v48 = vmul.f32 1.442695, %v804_v41 }
 0x6cf   :  { %v799_v49 = vpop.xlane.xlu1 %798  ;;  %v796_v51 = vpop.xlane.xlu0 %795 }
 0x6d0   :  { %1244 = vpow2.f32 %v818_v43  ;;  %v807_v53 = vsub.f32 %v775_v29, %v799_v49  ;;  %v806_v37 = vsub.f32 %v774_v32, %v796_v51 }
 0x6d1   :  { %1246 = vpow2.f32 %v816_v48 }
 0x6d2   :  { %v1237_v54 = vpop.eup %1236  ;;  %v822_v55 = vmul.f32 1.442695, %v807_v53  ;;  %v820_v36 = vmul.f32 1.442695, %v806_v37 }
 0x6d3   :  { %v1239_v56 = vpop.eup %1238  ;;  %v827_v57 = vsel %vm348_vm1, %v1237_v54, 0.0 }
 0x6d4   :  { %1248 = vpow2.f32 %v822_v55  ;;  %828 = vadd.xlane.f32.xlu1 %v827_v57  ;;  %v824_v58 = vsel %vm348_vm1, %v1239_v56, 0.0 }
 0x6d5   :  { %1250 = vpow2.f32 %v820_v36  ;;  %825 = vadd.xlane.f32.xlu0 %v824_v58 }
 0x6d6   :  { %v1241_v59 = vpop.eup %1240 }
 0x6d7   :  { %v1243_v60 = vpop.eup %1242  ;;  %v833_v61 = vsel %vm348_vm1, %v1241_v59, 0.0 }
 0x6d8   :  { %834 = vadd.xlane.f32.xlu1 %v833_v61  ;;  %v830_v62 = vsel %vm348_vm1, %v1243_v60, 0.0 }
 0x6d9   :  { %831 = vadd.xlane.f32.xlu0 %v830_v62 }
 0x6da   :  { %v1245_v63 = vpop.eup %1244 }
 0x6db   :  { %v1247_v0 = vpop.eup %1246  ;;  %v839_v2 = vsel %vm348_vm1, %v1245_v63, 0.0 }
 0x6dc   :  { %840 = vadd.xlane.f32.xlu1 %v839_v2  ;;  %v836_v1 = vsel %vm348_vm1, %v1247_v0, 0.0 }
 0x6dd   :  { %837 = vadd.xlane.f32.xlu0 %v836_v1 }
 0x6de   :  { %v1249_v4 = vpop.eup %1248 }
 0x6df   :  { %v1251_v3 = vpop.eup %1250  ;;  %v845_v5 = vsel %vm348_vm1, %v1249_v4, 0.0 }
 0x6e0   :  { %846 = vadd.xlane.f32.xlu1 %v845_v5  ;;  %v842_v6 = vsel %vm348_vm1, %v1251_v3, 0.0 }
 0x6e1   :  { %843 = vadd.xlane.f32.xlu0 %v842_v6 }
 0x761   :  { %v829_v7 = vpop.xlane.xlu1 %828 }
 0x762   :  { %1252 = vrcp.f32 %v829_v7  ;;  %v826_v8 = vpop.xlane.xlu0 %825 }
 0x763   :  { %1254 = vrcp.f32 %v826_v8 }
 0x765   :  { %v835_v9 = vpop.xlane.xlu1 %834 }
 0x766   :  { %1256 = vrcp.f32 %v835_v9  ;;  %v832_v10 = vpop.xlane.xlu0 %831 }
 0x767   :  { %1258 = vrcp.f32 %v832_v10 }
 0x769   :  { %v841_v11 = vpop.xlane.xlu1 %840 }
 0x76a   :  { %1260 = vrcp.f32 %v841_v11  ;;  %v838_v12 = vpop.xlane.xlu0 %837 }
 0x76b   :  { %1262 = vrcp.f32 %v838_v12 }
 0x76c   :  { %v1253_v13 = vpop.eup %1252 }
 0x76d   :  { %v1255_v17 = vpop.eup %1254  ;;  %v847_v18 = vpop.xlane.xlu1 %846  ;;  %v857_v19 = vmul.f32 %v1253_v13, %v1237_v54 }
 0x76e   :  { %1264 = vrcp.f32 %v847_v18  ;;  %v844_v20 = vpop.xlane.xlu0 %843  ;;  %v856_v14 = vmul.f32 %v1255_v17, %v1239_v56 }
 0x76f   :  { %1266 = vrcp.f32 %v844_v20 }
 0x770   :  { %v1257_v15 = vpop.eup %1256  ;;  %v864_v16 = vpack.c.bf16 %v857_v19, %v856_v14 }
 0x771   :  { %v1259_v21 = vpop.eup %1258  ;;  %v859_v22 = vmul.f32 %v1257_v15, %v1241_v59 }
 0x772   :  { %v858_v27 = vmul.f32 %v1259_v21, %v1243_v60  ;;  %1162 = vmatprep.mubr.msk.bf16.mxu1 %vm348_vm1, %v864_v16 }
 0x774   :  { %v1261_v24 = vpop.eup %1260  ;;  %v865_v25 = vpack.c.bf16 %v859_v22, %v858_v27 }
 0x775   :  { %v1263_v28 = vpop.eup %1262  ;;  %v861_v29 = vmul.f32 %v1261_v24, %v1245_v63 }
 0x776   :  { %1163 = vmatmul.mubr.msk.bf16.vlgmr.msra.gmra.mrb[12].mxu1 %vm348_vm1, %v865_v25  ;;  %v860_v32 = vmul.f32 %v1263_v28, %v1247_v0 }
 0x778   :  { %v1265_v23 = vpop.eup %1264  ;;  %v866_v40 = vpack.c.bf16 %v861_v29, %v860_v32 }
 0x779   :  { %v1267_v42 = vpop.eup %1266  ;;  %v863_v26 = vmul.f32 %v1265_v23, %v1249_v4 }
 0x77a   :  { %1166 = vmatprep.mubr.msk.bf16.mxu1 %vm348_vm1, %v866_v40  ;;  %v862_v33 = vmul.f32 %v1267_v42, %v1251_v3 }
 0x77c   :  { %v867_v38 = vpack.c.bf16 %v863_v26, %v862_v33 }
 0x77e   :  { %1167 = vmatmul.mubr.msk.bf16.gmra.mrb[16].mxu1 %vm348_vm1, %v867_v38 }
 0x849   :  { %v1164_v30 = vpop.f32.mrb[12].mxu1 }
 0x84a   :  { %v933_v31 = vadd.f32 %v1164_v30, %v989_v39  ;;  %v924_v34 = vpop.f32.mrb[13].mxu1 }
 0x84b   :  { %v925_v50 = vadd.f32 %v989_v39, %v924_v34  ;;  %v1165_v44 = vpop.f32.mrb[14].mxu1 }
 0x84c   :  { %957 = vst [vmem:[#allocation10 + $0x10] sm:$0xff] %v933_v31  ;;  %v936_v52 = vadd.f32 %v1165_v44, %v989_v39  ;;  %v927_v45 = vpop.f32.mrb[15].mxu1 }
 0x84d   :  { %955 = vst [vmem:[#allocation10] sm:$0xff] %v925_v50  ;;  %v928_v46 = vadd.f32 %v989_v39, %v927_v45 }
 0x84e   :  { %958 = vst [vmem:[#allocation10 + $0x18] sm:$0xff] %v936_v52 }
 0x84f   :  { %956 = vst [vmem:[#allocation10 + $0x8] sm:$0xff] %v928_v46 }
 0x851   :  { %v1168_v35 = vpop.f32.mrb[16].mxu1 }
 0x852   :  { %v949_v47 = vadd.f32 %v1168_v35, %v989_v39  ;;  %v940_v41 = vpop.f32.mrb[17].mxu1 }
 0x853   :  { %v941_v43 = vadd.f32 %v989_v39, %v940_v41  ;;  %v1169_v48 = vpop.f32.mrb[18].mxu1 }
 0x854   :  { %961 = vst [vmem:[#allocation10 + $0x30] sm:$0xff] %v949_v47  ;;  %v952_v49 = vadd.f32 %v1169_v48, %v989_v39  ;;  %v943_v51 = vpop.f32.mrb[19].mxu1 }
 0x855   :  { %959 = vst [vmem:[#allocation10 + $0x20] sm:$0xff] %v941_v43  ;;  %v944_v53 = vadd.f32 %v989_v39, %v943_v51 }
 0x856   :  { %962 = vst [vmem:[#allocation10 + $0x38] sm:$0xff] %v952_v49 }
 0x857   :  { %960 = vst [vmem:[#allocation10 + $0x28] sm:$0xff] %v944_v53 }
 0x858   :  { %1367 = shalt.err (!%p1364_p8)
}
 0x859   :  { %s1368_s12 = scalar_lea.hbm %s1691_s10, 1024 }
 0x85a   :  { %p1369_p9 = scmp.ne.s32.totalorder %s1691_s10, %s1368_s12  ;;  %p1372_p10 = scmp.lt.u32.totalorder %s1368_s12, %s1691_s10 }
 0x85c   :  { %p1374_p11 = pnand %p1372_p10, %p1369_p9 }
 0x85e   :  { %1377 = shalt.err (!%p1374_p11)
}
 0x85f   :  { %974 = dma.vmem_to_hbm [thread:$0]  %s969_s11, 1024, %s1691_s10, [#allocation4], %s1388_s25, %s1388_s25, %s1389_s26  }
 0x860   :  { %1384 = dma.done.wait [#allocation4], 1024  }
 0x861   :  { %1385 = vsyncadd [#allocation4], 4294966272 }
 0x862   :  { %978 = vsyncpa [#allocation3], 1 }
 0x863   :  { %979 = vsyncpa [#allocation6], 1 }
 0x864   :  { %980 = vsyncpa [#allocation9], 1 }
 0x865   :  { %981 = vsyncpa [#allocation4], 1 }

</bundles_post_ra>
